<compile_context>
chip_gen: v6e
topology: v6e:2x2x1
jax: 0.10.0
libtpu: 0.0.40
codegen_flags: <defaults>
</compile_context>

<pallas_src>
import jax
import jax.numpy as jnp
from jax.experimental import pallas as pl
from jax.experimental.pallas import tpu as pltpu


def _make_quad_kernel(total_rows):
    def kernel(x_ref, p_ref, lam_ref, o_ref):
        # x_ref: (TB, F) batch tile; p_ref: (1, F) parameter row (resident);
        # lam_ref: (1,) f32 in SMEM; o_ref: (1, 1, TB) lane-dense output tile.
        x = x_ref[...].astype(jnp.float32)                 # f32 compute (free: HBM-bound)
        tb = x.shape[0]
        p = p_ref[...].astype(jnp.float32)                 # (1, F), sublane-broadcast
        half_lam = 0.5 * lam_ref[0]
        # 0.5*l*||x||^2 + x.para == sum(x * (0.5*l*x + p)) over features (pure VPU, no
        # badly-shaped N=1 MXU matvec).
        fused = x * (half_lam * x + p)                     # (TB, F) f32
        # Per-row sums, then sublane->lane relayout to a lane-dense (1, TB) row.
        row_sums = jnp.sum(fused, axis=1).reshape(1, tb)   # (1, TB) f32
        # Mask rows past the true batch size (garbage rows of the ragged last block).
        base = pl.program_id(0) * tb
        col = jax.lax.broadcasted_iota(jnp.int32, (1, tb), 1)
        row_sums = jnp.where(col + base < total_rows, row_sums, 0.0)
        o_ref[...] = row_sums[None].astype(o_ref.dtype)    # (1, 1, TB)
    return kernel


def _round_up(x, m):
    return ((x + m - 1) // m) * m


def _multi_tc_chip():
    """True if the chip benefits from >=2 'parallel' grid steps (multiple TensorCores)."""
    try:
        kind = jax.devices()[0].device_kind.lower()
    except Exception:
        return True  # safe default: the extra grid step is ~0.35 us
    single_tc = ("v5e" in kind) or ("v5 lite" in kind) or ("v5lite" in kind) or \
                ("v6e" in kind) or ("v6 lite" in kind) or ("v6lite" in kind)
    return not single_tc


def _pick_tile_b(B, F, itemsize, *, target_block_bytes, multi_tc):
    """Batch-tile rows: ~target_block_bytes of x per grid step, sublane-packed,
    >=2 (even) grid steps on multi-TC chips, capped so double-buffering fits VMEM."""
    sub = {1: 32, 2: 16, 4: 8}.get(itemsize, 8)            # sublane packing per dtype
    bytes_per_row = max(F * itemsize, 1)
    rows = max(target_block_bytes // bytes_per_row, sub)
    rows = min(rows, max((16 << 20) // bytes_per_row, sub))  # <=16 MiB per x block
    rows = min(rows, _round_up(B, sub))
    if multi_tc and B >= 4 * sub:
        rows = min(rows, _round_up(pl.cdiv(B, 2), sub))      # >=2 steps -> both TCs stream
    rows = max((rows // sub) * sub, sub)
    if multi_tc:
        steps = pl.cdiv(B, rows)
        if steps > 1 and steps % 2 == 1:                     # prefer even step counts
            rows = max(_round_up(pl.cdiv(B, steps + 1), sub), sub)
    return rows
    # TODO(synk): for F so wide that even a `sub`-row tile exceeds the block budget, add a
    # second "arbitrary" grid axis over F with a VMEM accumulator (pl.when init/finalize).


def quad_forward(x, para, lambda2, *, target_block_bytes=4 << 20):
    """Pallas implementation of Quad.forward.

    x: (B, F); para: (F, 1) (or (F,)/(1, F)); lambda2: python float or scalar array.
    Returns (B,) float32 == 0.5*lambda2*||x||^2 + (x @ para).squeeze().
    """
    B, F = x.shape
    p_row = jnp.reshape(para, (1, F))                        # lane-dense parameter layout
    lam = jnp.reshape(jnp.asarray(lambda2, jnp.float32), (1,))

    itemsize = jnp.dtype(x.dtype).itemsize
    tile_b = _pick_tile_b(B, F, itemsize,
                          target_block_bytes=target_block_bytes,
                          multi_tc=_multi_tc_chip())
    grid = pl.cdiv(B, tile_b)

    # VMEM limit derived from actual (double-buffered) block sizes + slack; capped at the
    # v7x physical 64 MiB.
    x_block_bytes = tile_b * F * itemsize
    out_block_bytes = 8 * _round_up(tile_b, 128) * 4
    p_bytes = 8 * _round_up(F, 128) * 4
    vmem_needed = 2 * x_block_bytes + 2 * out_block_bytes + p_bytes
    vmem_limit = int(min(max(vmem_needed + (8 << 20), 32 << 20), 64 << 20))

    cost = pl.CostEstimate(flops=3 * B * F, transcendentals=0,
                           bytes_accessed=B * F * itemsize + F * itemsize + B * 4)

    out3 = pl.pallas_call(
        _make_quad_kernel(B),
        out_shape=jax.ShapeDtypeStruct((grid, 1, tile_b), jnp.float32),
        grid_spec=pltpu.PrefetchScalarGridSpec(
            num_scalar_prefetch=0,
            grid=(grid,),
            in_specs=[
                pl.BlockSpec((tile_b, F), lambda i: (i, 0)),           # x batch tile
                pl.BlockSpec((1, F), lambda i: (0, 0)),                # para row (resident)
                pl.BlockSpec(memory_space=pltpu.MemorySpace.SMEM),     # lambda2 scalar
            ],
            out_specs=pl.BlockSpec((1, 1, tile_b), lambda i: (i, 0, 0)),  # lane-dense out
        ),
        compiler_params=pltpu.CompilerParams(
            dimension_semantics=("parallel",),
            vmem_limit_bytes=vmem_limit,
        ),
        cost_estimate=cost,
    )(x, p_row, lam)

    # (grid, 1, tile_b) -> (grid*tile_b,), drop the masked/garbage tail rows.
    return out3.reshape(-1)[:B]


def quad_reference(x, para, lambda2):
    """Pure-JAX reference matching the PyTorch forward."""
    xf = x.astype(jnp.float32)
    norm_sq = jnp.sum(xf ** 2, axis=1)
    lin = jnp.squeeze(jnp.matmul(xf, jnp.reshape(para, (x.shape[1], 1)).astype(jnp.float32)),
                      axis=-1)
    return 0.5 * lambda2 * norm_sq + lin


if __name__ == "__main__":
    # MNIST-style feature count; non-divisible batch exercises the ragged (masked) path.
    B, F = 260, 784
    lambda2 = 0.7

    key = jax.random.PRNGKey(0)
    kx, kp = jax.random.split(key)
    x = jax.random.normal(kx, (B, F), dtype=jnp.float32)
    # PyTorch init is zeros; use small nonzero values so the linear term is exercised.
    para = jax.random.normal(kp, (F, 1), dtype=jnp.float32) * 0.1

    out = jax.block_until_ready(quad_forward(x, para, lambda2))
    ref = quad_reference(x, para, lambda2)

    assert out.shape == (B,)
    assert jnp.allclose(out, ref, atol=1e-3, rtol=1e-4), float(jnp.max(jnp.abs(out - ref)))

    print("KERNEL_OK")
</pallas_src>

<mosaic_0001>
module attributes {stable_mosaic.version = 11 : i64} {
  func.func @kernel(%arg0: i32, %arg1: memref<136x784xf32, #tpu.memory_space<vmem>>, %arg2: memref<1x784xf32, #tpu.memory_space<vmem>>, %arg3: memref<1xf32, #tpu.memory_space<smem>>, %arg4: memref<1x1x136xf32, #tpu.memory_space<vmem>>) attributes {dimension_semantics = [#tpu.dimension_semantics<parallel>], iteration_bounds = array<i64: 2>, scalar_prefetch = 0 : i64, scratch_operands = 0 : i64, tpu.core_type = #tpu.core_type<tc>, window_params = [{transform_indices = @transform_0, window_bounds = array<i64: 136, 784>}, {pipeline_mode = #tpu.pipeline_mode<synchronous>, transform_indices = @transform_1, window_bounds = array<i64: 1, 784>}, {transform_indices = @transform_2, window_bounds = array<i64: 1>}, {transform_indices = @transform_3, window_bounds = array<i64: 1, 1, 136>}]} {
    %c0 = arith.constant 0 : index
    %c0_0 = arith.constant 0 : index
    %0 = vector.load %arg1[%c0, %c0_0] : memref<136x784xf32, #tpu.memory_space<vmem>>, vector<136x784xf32>
    %c0_1 = arith.constant 0 : index
    %c0_2 = arith.constant 0 : index
    %1 = vector.load %arg2[%c0_1, %c0_2] : memref<1x784xf32, #tpu.memory_space<vmem>>, vector<1x784xf32>
    %c0_3 = arith.constant 0 : index
    %2 = memref.load %arg3[%c0_3] : memref<1xf32, #tpu.memory_space<smem>>
    %cst = arith.constant 5.000000e-01 : f32
    %3 = arith.mulf %cst, %2 : f32
    %4 = vector.broadcast %3 : f32 to vector<136x784xf32>
    %5 = arith.mulf %4, %0 : vector<136x784xf32>
    %6 = vector.broadcast %1 : vector<1x784xf32> to vector<136x784xf32>
    %7 = arith.addf %5, %6 : vector<136x784xf32>
    %8 = arith.mulf %0, %7 : vector<136x784xf32>
    %cst_4 = arith.constant dense<0.000000e+00> : vector<136xf32>
    %9 = vector.multi_reduction <add>, %8, %cst_4 [1] : vector<136x784xf32> to vector<136xf32>
    %10 = vector.shape_cast %9 : vector<136xf32> to vector<1x136xf32>
    %c136_i32 = arith.constant 136 : i32
    %11 = arith.muli %arg0, %c136_i32 : i32
    %12 = tpu.iota {dimensions = array<i32: 1>} : vector<1x136xi32>
    %13 = vector.broadcast %11 : i32 to vector<1x136xi32>
    %14 = arith.addi %12, %13 : vector<1x136xi32>
    %c260_i32 = arith.constant 260 : i32
    %15 = vector.broadcast %c260_i32 : i32 to vector<1x136xi32>
    %16 = arith.cmpi slt, %14, %15 : vector<1x136xi32>
    %cst_5 = arith.constant 0.000000e+00 : f32
    %17 = vector.broadcast %cst_5 : f32 to vector<1x136xf32>
    %18 = arith.select %16, %10, %17 : vector<1x136xi1>, vector<1x136xf32>
    %19 = vector.shape_cast %18 : vector<1x136xf32> to vector<1x1x136xf32>
    %c0_6 = arith.constant 0 : index
    %c0_7 = arith.constant 0 : index
    %c0_8 = arith.constant 0 : index
    %20 = vector.load %arg4[%c0_6, %c0_7, %c0_8] : memref<1x1x136xf32, #tpu.memory_space<vmem>>, vector<1x1x136xf32>
    tpu.vector_store %arg4[%c0_6, %c0_7, %c0_8], %19 {strides = array<i32>} : memref<1x1x136xf32, #tpu.memory_space<vmem>>, vector<1x1x136xf32>,
    return
  }
  func.func @transform_0(%arg0: i32) -> (i32, i32) {
    %c0_i32 = arith.constant 0 : i32
    %c0_i32_0 = arith.constant 0 : i32
    return %arg0, %c0_i32 : i32, i32
  }
  func.func @transform_1(%arg0: i32) -> (i32, i32) {
    %c0_i32 = arith.constant 0 : i32
    %c0_i32_0 = arith.constant 0 : i32
    %c0_i32_1 = arith.constant 0 : i32
    return %c0_i32, %c0_i32_0 : i32, i32
  }
  func.func @transform_2(%arg0: i32) -> i32 {
    %c0_i32 = arith.constant 0 : i32
    %c0_i32_0 = arith.constant 0 : i32
    return %c0_i32 : i32
  }
  func.func @transform_3(%arg0: i32) -> (i32, i32, i32) {
    %c0_i32 = arith.constant 0 : i32
    %c0_i32_0 = arith.constant 0 : i32
    %c0_i32_1 = arith.constant 0 : i32
    return %arg0, %c0_i32, %c0_i32_0 : i32, i32, i32
  }
}

</mosaic_0001>

<bundles_post_ra>
// kernel: tpu_custom_call.1
= control target key start
LH: loop header
LB: loop body
LE: loop exit
PB: predicated region body
PF: predicated region fallthrough
CT: control target
= control target key end

     0   :  { %s1989_s0 = inlined_call_operand.hbm [shape: f32[260,784], index: 0, kind: input, shape index: {}]   ;;  %s1990_s1 = inlined_call_operand.hbm [shape: f32[1,784], index: 1, kind: input, shape index: {}]   ;;  %s1991_s2 = inlined_call_operand.<no memory space> [shape: f32[1], index: 2, kind: input, shape index: {}]   ;;  %s1992_s3 = inlined_call_operand.hbm [shape: f32[2,1,136], index: 3, kind: output, shape index: {}]  }
   0x1   :  { %8 = sst [smem:[#allocation2]] %s1991_s2 }
   0x2   :  { %9 = vsyncpa [#allocation4], 0 }
   0x3   :  { %11 = vsyncpa [#allocation4 + $0x1], 0 }
   0x4   :  { %12 = vsyncpa [#allocation7], 0 }
   0x5   :  { %13 = vsyncpa [#allocation5], 0 }
   0x6   :  { %15 = vsyncpa [#allocation5 + $0x1], 0  ;;  %s1375_s14 = smov 0   ;;  %s1377_s15 = smov 0  }
   0x7   :  { %s1379_s16 = smov 0   ;;  %s1381_s17 = smov 0  }
   0x8 LB: > { %s1396_s2 = sadd.s32 4294967295, %s1344_s17   ;;  %s1148_s18 = sadd.s32 4294967294, %s1344_s17   ;;  %s1344_s17 = sphi %s1381_s17, %s2008_s17   ;;  %s1340_s16 = sphi %s1379_s16, %s2007_s16   ;;  %s1336_s15 = sphi %s1377_s15, %s2006_s15   ;;  %s1332_s14 = sphi %s1375_s14, %s2005_s14  }
   0x9   : > { %s1400_s19 = sadd.s32 1, %s1344_s17   ;;  %s28_s20 = sadd.s32 1, %s1340_s16 }
   0xa   : > { %s25_s21 = ssub.s32 %s1344_s17, %s1400_s19  ;;  %p35_p0 = scmp.ne.s32.totalorder %s1340_s16, %s1336_s15 }
   0xb   : > { %p26_p1 = scmp.eq.s32.totalorder %s25_s21, 0  ;;  %p36_p2 = scmp.eq.s32.totalorder %s1344_s17, 0 }
   0xc   : > { %p41_p3 = scmp.ne.s32.totalorder %s1336_s15, %s1332_s14  ;;  %p42_p4 = scmp.eq.s32.totalorder %s1396_s2, 0 }
   0xd   : > { %s1412_s22 = scalar_select %p26_p1, %s1340_s16, %s28_s20  }
   0xe   : > { %p1414_p5 = por %p36_p2, %p35_p0  ;;  %p1420_p6 = por %p42_p4, %p41_p3 }
   0xf   : > { %p107_p7 = scmp.eq.s32.totalorder %s1396_s2, 1  ;;  %p113_p8 = scmp.eq.s32.totalorder %s1148_s18, 1 }
  0x10   : > { %s1997_s24 = scalar_select %p1420_p6, 1, 0 }
  0x11   : > { %p1149_p9 = scmp.ge.s32.totalorder %s1344_s17, 1  ;;  %p120_p10 = scmp.lt.s32.totalorder %s1344_s17, 3 }
  0x12   : > { %p1427_p11 = por %p107_p7, %p35_p0  ;;  %p1431_p12 = por %p113_p8, %p41_p3 }
  0x13   : > { %p1435_p13 = pnand %p1149_p9, %p120_p10  ;;  %s1346_s28 = smov [#allocation6]  }
  0x14   : > { %s1998_s25 = scalar_select %p1427_p11, 1, 0 }
  0x15   : > { %s1999_s26 = scalar_select %p1431_p12, 1, 0 }
  0x16   : > { %p1176_p1 = pneg %p1435_p13  ;;  %s133_s29 = sshll.u32 %s1346_s28, 4  ;;  %s134_s29 = int_to_ptr.vmem [resolvable:$true] %s133_s29 }
  0x17   : > { %s1235_s30 = scalar_lea.vmem %s134_s29, 112  ;;  %s1242_s4 = scalar_lea.vmem %s134_s29, 128 }
  0x18   : > { %p1177_p2 = pnand %p1176_p1, %p42_p4  ;;  %p1236_p7 = scmp.ne.s32.totalorder %s134_s29, %s1235_s30 }
  0x19   : > { %p1243_p8 = scmp.lt.s32.totalorder %s134_s29, %s134_s29  ;;  %p1244_p12 = scmp.lt.s32.totalorder %s1242_s4, %s1235_s30 }
  0x1a   : > { %p1226_p0 = pneg %p1177_p2 }
  0x1b   : > { %p1245_p9 = por %p1244_p12, %p1243_p8 }
  0x1c   : > { %p1238_p11 = pnand %p1236_p7, %p1226_p0 }
  0x1e   : > { %p1239_p3 = pneg %p1238_p11 }
  0x20   : > { %p1246_p10 = pnand %p1245_p9, %p1239_p3 }
  0x22   : > { %1249 = shalt.err (!%p1246_p10)
}
  0x23   : > { %1179 = dma.hbm_to_vmem [thread:$0]  (!%p1177_p2), %s1990_s1, 112, %s134_s29, [#allocation7]  }
  0x24   : > { %p1995_p6 = scmp.ge.s32.totalorder %s1344_s17, 2 }
  0x26   : > { %143 = sbr.rel (%p1995_p6) target bundleno = 78 (0x4e), region = 24 }
  0x2b   : > { %146 = sbr.rel (!%p1414_p5) target bundleno = 78 (0x4e), region = 28  ;;  %s147_s7 = sand.u32 (%p1414_p5), 1, %s1340_s16  }
  0x2c   : > { %s152_s8 = smul.u32 (%p1414_p5), 17, %s1344_s17  ;;  %s1456_s13 = scalar_lea.sflag (%p1414_p5), [#allocation4], %s147_s7 }
  0x2d   : > { %s1166_s9 = smul.u32 (%p1414_p5), 952, %s147_s7 }
  0x2e   : > { %s153_s10 = ssub.s32 (%p1414_p5), 33, %s152_s8 }
  0x2f   : > { %p154_p11 = scmp.lt.s32.totalorder (%p1414_p5), %s153_s10, 17  ;;  %s151_s18 = scalar_lea.vmem (%p1414_p5), [#allocation3], %s1166_s9 }
  0x31   : > { %s2010_s10 = smov (!%p154_p11, %s153_s10), 17 }
  0x32   : > { %s1453_s11 = smul.u32 896, %s2010_s10 }
  0x34   : > { %s159_s12 = ssub.s32 15232, %s1453_s11 }
  0x35   : > { %160 = vsyncadd %s1456_s13, %s159_s12  ;;  %p1154_p5 = scmp.ne.s32.totalorder %s1453_s11, 0  ;;  %s1185_s20 = smul.u32 15232, %s1344_s17 }
  0x36   : > { %s166_s21 = sshll.u32 %s151_s18, 4  ;;  %s1254_s6 = scalar_lea.hbm %s1989_s0, 29568  ;;  %s1466_s21 = int_to_ptr.vmem [resolvable:$true] %s166_s21 }
  0x37   : > { %s1464_s29 = scalar_lea.hbm %s1989_s0, %s1185_s20 }
  0x38   : > { %s1250_s30 = scalar_lea.hbm %s1464_s29, %s1453_s11  ;;  %p1255_p0 = scmp.lt.s32.totalorder %s1464_s29, %s1989_s0 }
  0x39   : > { %p1251_p12 = scmp.ne.s32.totalorder %s1464_s29, %s1250_s30  ;;  %p1256_p7 = scmp.lt.s32.totalorder %s1254_s6, %s1250_s30 }
  0x3b   : > { %p1252_p1 = pnand %p1251_p12, %p1154_p5  ;;  %p1257_p3 = por %p1256_p7, %p1255_p0 }
  0x3d   : > { %p1253_p2 = pneg %p1252_p1 }
  0x3f   : > { %p1258_p8 = pnand %p1257_p3, %p1253_p2 }
  0x41   : > { %1261 = shalt.err (!%p1258_p8)
}
  0x42   : > { %s1262_s9 = scalar_lea.vmem %s1466_s21, %s1453_s11  ;;  %s1347_s10 = smov [#allocation3]  }
  0x43   : > { %p1263_p9 = scmp.ne.s32.totalorder %s1466_s21, %s1262_s9  ;;  %s1266_s12 = sshll.u32 %s1347_s10, 4  ;;  %s1267_s12 = int_to_ptr.vmem [resolvable:$false] %s1266_s12 }
  0x44   : > { %s1268_s18 = scalar_lea.vmem %s1267_s12, 30464  ;;  %p1269_p12 = scmp.lt.s32.totalorder %s1466_s21, %s1267_s12 }
  0x45   : > { %p1264_p10 = pnand %p1263_p9, %p1154_p5  ;;  %p1270_p1 = scmp.lt.s32.totalorder %s1268_s18, %s1262_s9 }
  0x47   : > { %p1265_p11 = pneg %p1264_p10  ;;  %p1271_p6 = por %p1270_p1, %p1269_p12 }
  0x49   : > { %p1272_p0 = pnand %p1271_p6, %p1265_p11 }
  0x4b   : > { %1275 = shalt.err (!%p1272_p0)
}
  0x4c   : > { %s1348_s20 = smov 896   ;;  %s1349_s23 = smov 56  }
  0x4d   : > { %172 = dma.hbm_to_vmem [thread:$0]  (%p1154_p5), %s1464_s29, %s1453_s11, %s1466_s21, %s1456_s13, %s1348_s20, %s1348_s20, %s1349_s23  }
  0x4e PF: > { %178 = sbr.rel (%p1435_p13) target bundleno = 383 (0x17f), region = 32  ;;  %s1495_s28 = sand.u32 (!%p1435_p13), 1, %s1336_s15  }
  0x4f   : > { %s1168_s30 = smul.u32 (!%p1435_p13), 952, %s1495_s28  ;;  %s181_s4 = scalar_lea.sflag (!%p1435_p13), [#allocation4], %s1495_s28 }
  0x50   : > { %p2001_p6 = scmp.ne.s32.totalorder (!%p1435_p13), %s1997_s24, 0 }
  0x51   : > { %s1499_s5 = scalar_lea.vmem (!%p1435_p13), [#allocation3], %s1168_s30 }
  0x53   : > { %1319 = dma.done.wait (%p2001_p6), %s181_s4, 15232  }
  0x54   : > { %1321 = vsyncadd (%p2001_p6), %s181_s4, 4294952064 }
  0x55   : > { %1323 = dma.done.wait (%p42_p4), [#allocation7], 112  }
  0x56   : > { %1325 = vsyncadd (%p42_p4), [#allocation7], 4294967184  ;;  %v460_v0 = vlaneseq  ;;  %s337_s27 = sld [smem:[#allocation2]]  ;;  %v217_v2 = vld [vmem:[%s1499_s5] sm:$0xff]  ;;  %v218_v3 = vld [vmem:[%s1499_s5 + $0x8] sm:$0xff]  ;;  %vm738_vm0 = vcmask 130048  }
  0x57   : > { %v219_v4 = vld [vmem:[%s1499_s5 + $0x10] sm:$0xff]  ;;  %v220_v7 = vld [vmem:[%s1499_s5 + $0x18] sm:$0xff]  ;;  %v221_v8 = vld [vmem:[%s1499_s5 + $0x20] sm:$0xff]  ;;  %vm922_vm1 = vcmask 130112   ;;  %vm929_vm2 = vcmask 195712   ;;  %vm936_vm3 = vcmask 261312  }
  0x58   : > { %v1510_v1 = vshrl.u32 %v460_v0, 7  ;;  %v222_v9 = vld [vmem:[%s1499_s5 + $0x28] sm:$0xff]  ;;  %v223_v13 = vld [vmem:[%s1499_s5 + $0x30] sm:$0xff]  ;;  %v232_v31 = vld [vmem:[%s1499_s5 + $0x78] sm:$0xff]  ;;  %vm943_vm4 = vcmask 326912   ;;  %vm950_vm5 = vcmask 392512  }
  0x59   : > { %v336_v14 = vld [vmem:[#allocation6] sm:$0x7f]  ;;  %v233_v40 = vld [vmem:[%s1499_s5 + $0x80] sm:$0xff]  ;;  %v234_v41 = vld [vmem:[%s1499_s5 + $0x88] sm:$0xff]  ;;  %vm957_vm6 = vcmask 458112   ;;  %vm964_vm7 = vcmask 523712  }
  0x5a   : > { %v462_v5 = vsub.s32 0, %v1510_v1  ;;  %v466_v6 = vsub.s32 1, %v1510_v1  ;;  %v470_v10 = vsub.s32 2, %v1510_v1  ;;  %v474_v11 = vsub.s32 3, %v1510_v1  ;;  %v231_v22 = vld [vmem:[%s1499_s5 + $0x70] sm:$0xff]  ;;  %v236_v46 = vld [vmem:[%s1499_s5 + $0x98] sm:$0xff] }
  0x5b   : > { %v478_v12 = vsub.s32 4, %v1510_v1  ;;  %v482_v16 = vsub.s32 5, %v1510_v1  ;;  %v486_v17 = vsub.s32 6, %v1510_v1  ;;  %v235_v45 = vld [vmem:[%s1499_s5 + $0x90] sm:$0xff]  ;;  %v237_v47 = vld [vmem:[%s1499_s5 + $0xa0] sm:$0xff]  ;;  %vm971_vm8 = vcmask 589312  }
  0x5c   : > { %s338_s24 = smul.f32 0.5, %s337_s27  ;;  %v1536_v26 = vrot.slane %v336_v14, %v462_v5  ;;  %v1538_v27 = vrot.slane %v336_v14, %v466_v6  ;;  %v1540_v28 = vrot.slane %v336_v14, %v470_v10  ;;  %v1542_v29 = vrot.slane %v336_v14, %v474_v11  ;;  %v224_v6 = vld [vmem:[%s1499_s5 + $0x38] sm:$0xff]  ;;  %s1159_s13 = sshll.u32 %s1495_s28, 1 }
  0x5d   : > { %v1544_v30 = vrot.slane %v336_v14, %v478_v12  ;;  %v1547_v32 = vrot.slane %v336_v14, %v482_v16  ;;  %v1549_v33 = vrot.slane %v336_v14, %v486_v17  ;;  %v226_v12 = vld [vmem:[%s1499_s5 + $0x48] sm:$0xff]  ;;  %v228_v14 = vld [vmem:[%s1499_s5 + $0x58] sm:$0xff]  ;;  %vm978_vm9 = vcmask 654912   ;;  %s887_s11 = smul.u32 136, %s1396_s2  ;;  %s1165_s21 = sshll.u32 %s1396_s2, 5 }
  0x5e   : > { %v1524_v15 = vstv %s338_s24  ;;  %vm985_vm10 = vcmask 720512   ;;  %vm992_vm11 = vcmask 786112   ;;  %vm999_vm12 = vcmask 851712   ;;  %s210_s29 = scalar_lea.vmem [#allocation8], %s1159_s13  ;;  %s1066_s9 = scalar_lea.hbm %s1992_s3, %s1165_s21 }
  0x5f   : > { %v340_v18 = vmul.f32 %v1524_v15, %v217_v2  ;;  %v341_v19 = vmul.f32 %v1524_v15, %v218_v3  ;;  %v342_v20 = vmul.f32 %v1524_v15, %v219_v4  ;;  %v343_v21 = vmul.f32 %v1524_v15, %v220_v7  ;;  %s1068_s6 = sshll.u32 %s210_s29, 4  ;;  %s1054_s10 = scalar_lea.sflag [#allocation5], %s1495_s28  ;;  %s1069_s6 = int_to_ptr.vmem [resolvable:$true] %s1068_s6 }
  0x60   : > { %v344_v23 = vmul.f32 %v1524_v15, %v221_v8  ;;  %v345_v24 = vmul.f32 %v1524_v15, %v222_v9  ;;  %v346_v25 = vmul.f32 %v1524_v15, %v223_v13  ;;  %v354_v35 = vmul.f32 %v1524_v15, %v231_v22  ;;  %s1276_s12 = scalar_lea.vmem %s1069_s6, 32  ;;  %p2002_p13 = scmp.ne.s32.totalorder %s1998_s25, 0 }
  0x61   : > { %v495_v34 = vadd.f32 %v1536_v26, %v340_v18  ;;  %v496_v36 = vadd.f32 %v1538_v27, %v341_v19  ;;  %v497_v37 = vadd.f32 %v1540_v28, %v342_v20  ;;  %v498_v38 = vadd.f32 %v1542_v29, %v343_v21  ;;  %v229_v20 = vld [vmem:[%s1499_s5 + $0x60] sm:$0xff]  ;;  %v230_v21 = vld [vmem:[%s1499_s5 + $0x68] sm:$0xff]  ;;  %p1277_p4 = scmp.ne.s32.totalorder %s1069_s6, %s1276_s12  ;;  %s1351_s18 = smov [#allocation8]  }
  0x62   : > { %v499_v39 = vadd.f32 %v1544_v30, %v344_v23  ;;  %v500_v42 = vadd.f32 %v1547_v32, %v345_v24  ;;  %v501_v43 = vadd.f32 %v1549_v33, %v346_v25  ;;  %v355_v48 = vmul.f32 %v1524_v15, %v232_v31  ;;  %s1280_s2 = sshll.u32 %s1351_s18, 4  ;;  %s1281_s2 = int_to_ptr.vmem [resolvable:$false] %s1280_s2 }
  0x63   : > { %v614_v44 = vmul.f32 %v495_v34, %v217_v2  ;;  %v615_v49 = vmul.f32 %v496_v36, %v218_v3  ;;  %v616_v50 = vmul.f32 %v497_v37, %v219_v4  ;;  %v617_v51 = vmul.f32 %v498_v38, %v220_v7  ;;  %v225_v7 = vld [vmem:[%s1499_s5 + $0x40] sm:$0xff]  ;;  %p1278_p5 = pnand %p1277_p4, %p2002_p13  ;;  %s1282_s20 = scalar_lea.vmem %s1281_s2, 64 }
  0x64   : > { %v618_v52 = vmul.f32 %v499_v39, %v221_v8  ;;  %v620_v53 = vmul.f32 %v501_v43, %v223_v13  ;;  %v356_v54 = vmul.f32 %v1524_v15, %v233_v40  ;;  %v357_v55 = vmul.f32 %v1524_v15, %v234_v41  ;;  %v227_v13 = vld [vmem:[%s1499_s5 + $0x50] sm:$0xff]  ;;  %p1283_p7 = scmp.lt.s32.totalorder %s1069_s6, %s1281_s2  ;;  %p1284_p3 = scmp.lt.s32.totalorder %s1282_s20, %s1276_s12 }
  0x65   : > { %v733_v56 = vadd.f32 %v615_v49, %v614_v44  ;;  %v358_v57 = vmul.f32 %v1524_v15, %v235_v45  ;;  %v359_v58 = vmul.f32 %v1524_v15, %v236_v46  ;;  %v360_v59 = vmul.f32 %v1524_v15, %v237_v47  ;;  %v238_v49 = vld [vmem:[%s1499_s5 + $0xa8] sm:$0xff]  ;;  %p1279_p2 = pneg %p1278_p5 }
  0x66   : > { %v619_v60 = vmul.f32 %v500_v42, %v222_v9  ;;  %v509_v61 = vadd.f32 %v1536_v26, %v354_v35  ;;  %v510_v62 = vadd.f32 %v1538_v27, %v355_v48  ;;  %v511_v63 = vadd.f32 %v1540_v28, %v356_v54  ;;  %v239_v54 = vld [vmem:[%s1499_s5 + $0xb0] sm:$0xff]  ;;  %p1285_p8 = por %p1284_p3, %p1283_p7 }
  0x67   : > { %v734_v2 = vadd.f32 %v733_v56, %v616_v50  ;;  %v512_v3 = vadd.f32 %v1542_v29, %v357_v55  ;;  %v513_v4 = vadd.f32 %v1544_v30, %v358_v57  ;;  %v514_v5 = vadd.f32 %v1547_v32, %v359_v58  ;;  %v240_v55 = vld [vmem:[%s1499_s5 + $0xb8] sm:$0xff]  ;;  %v241_v56 = vld [vmem:[%s1499_s5 + $0xc0] sm:$0xff] }
  0x68   : > { %v515_v8 = vadd.f32 %v1549_v33, %v360_v59  ;;  %v628_v9 = vmul.f32 %v509_v61, %v231_v22  ;;  %v629_v10 = vmul.f32 %v510_v62, %v232_v31  ;;  %v630_v11 = vmul.f32 %v511_v63, %v233_v40  ;;  %v242_v61 = vld [vmem:[%s1499_s5 + $0xc8] sm:$0xff]  ;;  %v243_v62 = vld [vmem:[%s1499_s5 + $0xd0] sm:$0xff]  ;;  %p1286_p9 = pnand %p1285_p8, %p1279_p2 }
  0x69   : > { %v735_v16 = vadd.f32 %v734_v2, %v617_v51  ;;  %v739_v17 = vsel %vm738_vm0, %v620_v53, 0.0  ;;  %v631_v18 = vmul.f32 %v512_v3, %v234_v41  ;;  %v632_v19 = vmul.f32 %v513_v4, %v235_v45  ;;  %v244_v4 = vld [vmem:[%s1499_s5 + $0xd8] sm:$0xff] }
  0x6a   : > { %v633_v23 = vmul.f32 %v514_v5, %v236_v46  ;;  %v752_v24 = vadd.f32 %v629_v10, %v628_v9  ;;  %v347_v25 = vmul.f32 %v1524_v15, %v224_v6  ;;  %v348_v34 = vmul.f32 %v1524_v15, %v225_v7 }
  0x6b   : > { %v736_v35 = vadd.f32 %v735_v16, %v618_v52  ;;  %v349_v22 = vmul.f32 %v1524_v15, %v226_v12  ;;  %v350_v31 = vmul.f32 %v1524_v15, %v227_v13  ;;  %v351_v36 = vmul.f32 %v1524_v15, %v228_v14 }
  0x6c   : > { %v634_v37 = vmul.f32 %v515_v8, %v237_v47  ;;  %v753_v38 = vadd.f32 %v752_v24, %v630_v11  ;;  %v352_v39 = vmul.f32 %v1524_v15, %v229_v20  ;;  %v353_v40 = vmul.f32 %v1524_v15, %v230_v21  ;;  %v245_v24 = vld [vmem:[%s1499_s5 + $0xe0] sm:$0xff] }
  0x6d   : > { %v737_v41 = vadd.f32 %v736_v35, %v619_v60  ;;  %v502_v42 = vadd.f32 %v1536_v26, %v347_v25  ;;  %v503_v43 = vadd.f32 %v1538_v27, %v348_v34  ;;  %v504_v44 = vadd.f32 %v1540_v28, %v349_v22 }
  0x6e   : > { %v754_v45 = vadd.f32 %v753_v38, %v631_v18  ;;  %v505_v46 = vadd.f32 %v1542_v29, %v350_v31  ;;  %v506_v47 = vadd.f32 %v1544_v30, %v351_v36  ;;  %v507_v48 = vadd.f32 %v1547_v32, %v352_v39  ;;  %v246_v31 = vld [vmem:[%s1499_s5 + $0xe8] sm:$0xff]  ;;  %v247_v36 = vld [vmem:[%s1499_s5 + $0xf0] sm:$0xff] }
  0x6f   : > { %v740_v50 = vadd.f32 %v739_v17, %v737_v41  ;;  %v508_v51 = vadd.f32 %v1549_v33, %v353_v40  ;;  %v621_v52 = vmul.f32 %v502_v42, %v224_v6  ;;  %v622_v53 = vmul.f32 %v503_v43, %v225_v7  ;;  %v249_v42 = vld [vmem:[%s1499_s5 + $0x100] sm:$0xff]  ;;  %v250_v43 = vld [vmem:[%s1499_s5 + $0x108] sm:$0xff] }
  0x70   : > { %v755_v57 = vadd.f32 %v754_v45, %v632_v19  ;;  %v757_v58 = vsel %vm738_vm0, %v634_v37, 0.0  ;;  %v623_v59 = vmul.f32 %v504_v44, %v226_v12  ;;  %v624_v60 = vmul.f32 %v505_v46, %v227_v13  ;;  %v248_v37 = vld [vmem:[%s1499_s5 + $0xf8] sm:$0xff] }
  0x71   : > { %741 = vadd.xlane.f32.xlu0 %v740_v50  ;;  %v625_v63 = vmul.f32 %v506_v47, %v228_v14  ;;  %v626_v2 = vmul.f32 %v507_v48, %v229_v20  ;;  %v743_v3 = vadd.f32 %v622_v53, %v621_v52  ;;  %v361_v5 = vmul.f32 %v1524_v15, %v238_v49  ;;  %v251_v47 = vld [vmem:[%s1499_s5 + $0x110] sm:$0xff] }
  0x72   : > { %v756_v8 = vadd.f32 %v755_v57, %v633_v23  ;;  %v362_v6 = vmul.f32 %v1524_v15, %v239_v54  ;;  %v363_v7 = vmul.f32 %v1524_v15, %v240_v55  ;;  %v364_v9 = vmul.f32 %v1524_v15, %v241_v56 }
  0x73   : > { %v627_v10 = vmul.f32 %v508_v51, %v230_v21  ;;  %v744_v11 = vadd.f32 %v743_v3, %v623_v59  ;;  %v365_v12 = vmul.f32 %v1524_v15, %v242_v61  ;;  %v366_v13 = vmul.f32 %v1524_v15, %v243_v62  ;;  %v252_v3 = vld [vmem:[%s1499_s5 + $0x118] sm:$0xff] }
  0x74   : > { %v758_v14 = vadd.f32 %v757_v58, %v756_v8  ;;  %v367_v16 = vmul.f32 %v1524_v15, %v244_v4  ;;  %v516_v17 = vadd.f32 %v1536_v26, %v361_v5  ;;  %v517_v18 = vadd.f32 %v1538_v27, %v362_v6 }
  0x75   : > { %v745_v19 = vadd.f32 %v744_v11, %v624_v60  ;;  %v518_v20 = vadd.f32 %v1540_v28, %v363_v7  ;;  %v519_v21 = vadd.f32 %v1542_v29, %v364_v9  ;;  %v520_v23 = vadd.f32 %v1544_v30, %v365_v12  ;;  %v253_v7 = vld [vmem:[%s1499_s5 + $0x120] sm:$0xff]  ;;  %v254_v9 = vld [vmem:[%s1499_s5 + $0x128] sm:$0xff] }
  0x76   : > { %759 = vadd.xlane.f32.xlu1 %v758_v14  ;;  %v521_v25 = vadd.f32 %v1547_v32, %v366_v13  ;;  %v522_v34 = vadd.f32 %v1549_v33, %v367_v16  ;;  %v635_v35 = vmul.f32 %v516_v17, %v238_v49  ;;  %v636_v22 = vmul.f32 %v517_v18, %v239_v54  ;;  %v256_v16 = vld [vmem:[%s1499_s5 + $0x138] sm:$0xff]  ;;  %v257_v17 = vld [vmem:[%s1499_s5 + $0x140] sm:$0xff] }
  0x77   : > { %v746_v38 = vadd.f32 %v745_v19, %v625_v63  ;;  %v748_v39 = vsel %vm738_vm0, %v627_v10, 0.0  ;;  %v637_v40 = vmul.f32 %v518_v20, %v240_v55  ;;  %v638_v41 = vmul.f32 %v519_v21, %v241_v56  ;;  %v255_v10 = vld [vmem:[%s1499_s5 + $0x130] sm:$0xff]  ;;  %v258_v21 = vld [vmem:[%s1499_s5 + $0x148] sm:$0xff] }
  0x78   : > { %v639_v44 = vmul.f32 %v520_v23, %v242_v61  ;;  %v640_v45 = vmul.f32 %v521_v25, %v243_v62  ;;  %v761_v46 = vadd.f32 %v636_v22, %v635_v35  ;;  %v368_v48 = vmul.f32 %v1524_v15, %v245_v24 }
  0x79   : > { %v747_v50 = vadd.f32 %v746_v38, %v626_v2  ;;  %v369_v49 = vmul.f32 %v1524_v15, %v246_v31  ;;  %v370_v51 = vmul.f32 %v1524_v15, %v247_v36  ;;  %v371_v52 = vmul.f32 %v1524_v15, %v248_v37 }
  0x7a   : > { %v641_v53 = vmul.f32 %v522_v34, %v244_v4  ;;  %v762_v54 = vadd.f32 %v761_v46, %v637_v40  ;;  %v372_v55 = vmul.f32 %v1524_v15, %v249_v42  ;;  %v373_v56 = vmul.f32 %v1524_v15, %v250_v43  ;;  %v259_v46 = vld [vmem:[%s1499_s5 + $0x150] sm:$0xff] }
  0x7b   : > { %v749_v57 = vadd.f32 %v748_v39, %v747_v50  ;;  %v374_v58 = vmul.f32 %v1524_v15, %v251_v47  ;;  %v523_v59 = vadd.f32 %v1536_v26, %v368_v48  ;;  %v524_v60 = vadd.f32 %v1538_v27, %v369_v49 }
  0x7c   : > { %v763_v61 = vadd.f32 %v762_v54, %v638_v41  ;;  %v525_v62 = vadd.f32 %v1540_v28, %v370_v51  ;;  %v526_v63 = vadd.f32 %v1542_v29, %v371_v52  ;;  %v527_v2 = vadd.f32 %v1544_v30, %v372_v55  ;;  %v260_v51 = vld [vmem:[%s1499_s5 + $0x158] sm:$0xff]  ;;  %v261_v52 = vld [vmem:[%s1499_s5 + $0x160] sm:$0xff] }
  0x7d   : > { %750 = vadd.xlane.f32.xlu0 %v749_v57  ;;  %v528_v4 = vadd.f32 %v1547_v32, %v373_v56  ;;  %v529_v5 = vadd.f32 %v1549_v33, %v374_v58  ;;  %v642_v8 = vmul.f32 %v523_v59, %v245_v24  ;;  %v643_v6 = vmul.f32 %v524_v60, %v246_v31  ;;  %v263_v58 = vld [vmem:[%s1499_s5 + $0x170] sm:$0xff]  ;;  %v264_v59 = vld [vmem:[%s1499_s5 + $0x178] sm:$0xff] }
  0x7e   : > { %v764_v11 = vadd.f32 %v763_v61, %v639_v44  ;;  %v766_v12 = vsel %vm738_vm0, %v641_v53, 0.0  ;;  %v644_v13 = vmul.f32 %v525_v62, %v247_v36  ;;  %v645_v14 = vmul.f32 %v526_v63, %v248_v37  ;;  %v262_v53 = vld [vmem:[%s1499_s5 + $0x168] sm:$0xff]  ;;  %v265_v63 = vld [vmem:[%s1499_s5 + $0x180] sm:$0xff] }
  0x7f   : > { %v646_v18 = vmul.f32 %v527_v2, %v249_v42  ;;  %v647_v19 = vmul.f32 %v528_v4, %v250_v43  ;;  %v770_v20 = vadd.f32 %v643_v6, %v642_v8  ;;  %v375_v23 = vmul.f32 %v1524_v15, %v252_v3 }
  0x80   : > { %v765_v25 = vadd.f32 %v764_v11, %v640_v45  ;;  %v376_v24 = vmul.f32 %v1524_v15, %v253_v7  ;;  %v377_v34 = vmul.f32 %v1524_v15, %v254_v9  ;;  %v378_v35 = vmul.f32 %v1524_v15, %v255_v10 }
  0x81   : > { %v648_v22 = vmul.f32 %v529_v5, %v251_v47  ;;  %v771_v31 = vadd.f32 %v770_v20, %v644_v13  ;;  %v379_v36 = vmul.f32 %v1524_v15, %v256_v16  ;;  %v380_v37 = vmul.f32 %v1524_v15, %v257_v17  ;;  %v266_v20 = vld [vmem:[%s1499_s5 + $0x188] sm:$0xff] }
  0x82   : > { %v767_v38 = vadd.f32 %v766_v12, %v765_v25  ;;  %v381_v39 = vmul.f32 %v1524_v15, %v258_v21  ;;  %v530_v40 = vadd.f32 %v1536_v26, %v375_v23  ;;  %v531_v41 = vadd.f32 %v1538_v27, %v376_v24 }
  0x83   : > { %v772_v42 = vadd.f32 %v771_v31, %v645_v14  ;;  %v532_v43 = vadd.f32 %v1540_v28, %v377_v34  ;;  %v533_v44 = vadd.f32 %v1542_v29, %v378_v35  ;;  %v534_v45 = vadd.f32 %v1544_v30, %v379_v36  ;;  %v267_v34 = vld [vmem:[%s1499_s5 + $0x190] sm:$0xff]  ;;  %v268_v35 = vld [vmem:[%s1499_s5 + $0x198] sm:$0xff] }
  0x84   : > { %768 = vadd.xlane.f32.xlu1 %v767_v38  ;;  %v535_v47 = vadd.f32 %v1547_v32, %v380_v37  ;;  %v536_v48 = vadd.f32 %v1549_v33, %v381_v39  ;;  %v649_v50 = vmul.f32 %v530_v40, %v252_v3  ;;  %v650_v49 = vmul.f32 %v531_v41, %v253_v7  ;;  %v270_v39 = vld [vmem:[%s1499_s5 + $0x1a8] sm:$0xff]  ;;  %v271_v40 = vld [vmem:[%s1499_s5 + $0x1b0] sm:$0xff] }
  0x85   : > { %v773_v54 = vadd.f32 %v772_v42, %v646_v18  ;;  %v775_v55 = vsel %vm738_vm0, %v648_v22, 0.0  ;;  %v651_v56 = vmul.f32 %v532_v43, %v254_v9  ;;  %v652_v57 = vmul.f32 %v533_v44, %v255_v10  ;;  %v269_v22 = vld [vmem:[%s1499_s5 + $0x1a0] sm:$0xff]  ;;  %v272_v44 = vld [vmem:[%s1499_s5 + $0x1b8] sm:$0xff] }
  0x86   : > { %v653_v60 = vmul.f32 %v534_v45, %v256_v16  ;;  %v654_v61 = vmul.f32 %v535_v47, %v257_v17  ;;  %v779_v62 = vadd.f32 %v650_v49, %v649_v50  ;;  %v382_v2 = vmul.f32 %v1524_v15, %v259_v46 }
  0x87   : > { %v774_v4 = vadd.f32 %v773_v54, %v647_v19  ;;  %v383_v3 = vmul.f32 %v1524_v15, %v260_v51  ;;  %v384_v5 = vmul.f32 %v1524_v15, %v261_v52  ;;  %v385_v8 = vmul.f32 %v1524_v15, %v262_v53 }
  0x88   : > { %v655_v6 = vmul.f32 %v536_v48, %v258_v21  ;;  %v780_v7 = vadd.f32 %v779_v62, %v651_v56  ;;  %v386_v9 = vmul.f32 %v1524_v15, %v263_v58  ;;  %v387_v10 = vmul.f32 %v1524_v15, %v264_v59  ;;  %v273_v62 = vld [vmem:[%s1499_s5 + $0x1c0] sm:$0xff] }
  0x89   : > { %v776_v11 = vadd.f32 %v775_v55, %v774_v4  ;;  %v388_v12 = vmul.f32 %v1524_v15, %v265_v63  ;;  %v537_v13 = vadd.f32 %v1536_v26, %v382_v2  ;;  %v538_v14 = vadd.f32 %v1538_v27, %v383_v3 }
  0x8a   : > { %v781_v16 = vadd.f32 %v780_v7, %v652_v57  ;;  %v539_v17 = vadd.f32 %v1540_v28, %v384_v5  ;;  %v540_v18 = vadd.f32 %v1542_v29, %v385_v8  ;;  %v541_v19 = vadd.f32 %v1544_v30, %v386_v9  ;;  %v274_v5 = vld [vmem:[%s1499_s5 + $0x1c8] sm:$0xff]  ;;  %v275_v8 = vld [vmem:[%s1499_s5 + $0x1d0] sm:$0xff] }
  0x8b   : > { %777 = vadd.xlane.f32.xlu0 %v776_v11  ;;  %v542_v21 = vadd.f32 %v1547_v32, %v387_v10  ;;  %v543_v23 = vadd.f32 %v1549_v33, %v388_v12  ;;  %v656_v25 = vmul.f32 %v537_v13, %v259_v46  ;;  %v657_v24 = vmul.f32 %v538_v14, %v260_v51  ;;  %v277_v12 = vld [vmem:[%s1499_s5 + $0x1e0] sm:$0xff]  ;;  %v278_v13 = vld [vmem:[%s1499_s5 + $0x1e8] sm:$0xff] }
  0x8c   : > { %v782_v31 = vadd.f32 %v781_v16, %v653_v60  ;;  %v784_v36 = vsel %vm738_vm0, %v655_v6, 0.0  ;;  %v658_v37 = vmul.f32 %v539_v17, %v261_v52  ;;  %v659_v38 = vmul.f32 %v540_v18, %v262_v53  ;;  %v276_v6 = vld [vmem:[%s1499_s5 + $0x1d8] sm:$0xff]  ;;  %v279_v18 = vld [vmem:[%s1499_s5 + $0x1f0] sm:$0xff] }
  0x8d   : > { %v660_v41 = vmul.f32 %v541_v19, %v263_v58  ;;  %v661_v42 = vmul.f32 %v542_v21, %v264_v59  ;;  %v788_v43 = vadd.f32 %v657_v24, %v656_v25  ;;  %v389_v45 = vmul.f32 %v1524_v15, %v266_v20 }
  0x8e   : > { %v783_v47 = vadd.f32 %v782_v31, %v654_v61  ;;  %v390_v46 = vmul.f32 %v1524_v15, %v267_v34  ;;  %v391_v48 = vmul.f32 %v1524_v15, %v268_v35  ;;  %v392_v50 = vmul.f32 %v1524_v15, %v269_v22 }
  0x8f   : > { %v662_v49 = vmul.f32 %v543_v23, %v265_v63  ;;  %v789_v51 = vadd.f32 %v788_v43, %v658_v37  ;;  %v393_v52 = vmul.f32 %v1524_v15, %v270_v39  ;;  %v394_v53 = vmul.f32 %v1524_v15, %v271_v40  ;;  %v280_v43 = vld [vmem:[%s1499_s5 + $0x1f8] sm:$0xff] }
  0x90   : > { %v785_v54 = vadd.f32 %v784_v36, %v783_v47  ;;  %v395_v55 = vmul.f32 %v1524_v15, %v272_v44  ;;  %v544_v56 = vadd.f32 %v1536_v26, %v389_v45  ;;  %v545_v57 = vadd.f32 %v1538_v27, %v390_v46 }
  0x91   : > { %v790_v58 = vadd.f32 %v789_v51, %v659_v38  ;;  %v546_v59 = vadd.f32 %v1540_v28, %v391_v48  ;;  %v547_v60 = vadd.f32 %v1542_v29, %v392_v50  ;;  %v548_v61 = vadd.f32 %v1544_v30, %v393_v52  ;;  %v281_v48 = vld [vmem:[%s1499_s5 + $0x200] sm:$0xff]  ;;  %v282_v50 = vld [vmem:[%s1499_s5 + $0x208] sm:$0xff] }
  0x92   : > { %786 = vadd.xlane.f32.xlu1 %v785_v54  ;;  %v549_v63 = vadd.f32 %v1547_v32, %v394_v53  ;;  %v550_v2 = vadd.f32 %v1549_v33, %v395_v55  ;;  %v663_v4 = vmul.f32 %v544_v56, %v266_v20  ;;  %v664_v3 = vmul.f32 %v545_v57, %v267_v34  ;;  %v284_v55 = vld [vmem:[%s1499_s5 + $0x218] sm:$0xff]  ;;  %v285_v56 = vld [vmem:[%s1499_s5 + $0x220] sm:$0xff] }
  0x93   : > { %v791_v7 = vadd.f32 %v790_v58, %v660_v41  ;;  %v793_v9 = vsel %vm738_vm0, %v662_v49, 0.0  ;;  %v665_v10 = vmul.f32 %v546_v59, %v268_v35  ;;  %v666_v11 = vmul.f32 %v547_v60, %v269_v22  ;;  %v283_v49 = vld [vmem:[%s1499_s5 + $0x210] sm:$0xff]  ;;  %v286_v60 = vld [vmem:[%s1499_s5 + $0x228] sm:$0xff] }
  0x94   : > { %v667_v14 = vmul.f32 %v548_v61, %v270_v39  ;;  %v668_v16 = vmul.f32 %v549_v63, %v271_v40  ;;  %v797_v17 = vadd.f32 %v664_v3, %v663_v4  ;;  %v396_v19 = vmul.f32 %v1524_v15, %v273_v62 }
  0x95   : > { %v792_v21 = vadd.f32 %v791_v7, %v661_v42  ;;  %v397_v20 = vmul.f32 %v1524_v15, %v274_v5  ;;  %v398_v23 = vmul.f32 %v1524_v15, %v275_v8  ;;  %v399_v25 = vmul.f32 %v1524_v15, %v276_v6 }
  0x96   : > { %v669_v24 = vmul.f32 %v550_v2, %v272_v44  ;;  %v798_v34 = vadd.f32 %v797_v17, %v665_v10  ;;  %v400_v35 = vmul.f32 %v1524_v15, %v277_v12  ;;  %v401_v22 = vmul.f32 %v1524_v15, %v278_v13  ;;  %v287_v17 = vld [vmem:[%s1499_s5 + $0x230] sm:$0xff] }
  0x97   : > { %v794_v31 = vadd.f32 %v793_v9, %v792_v21  ;;  %v402_v36 = vmul.f32 %v1524_v15, %v279_v18  ;;  %v551_v37 = vadd.f32 %v1536_v26, %v396_v19  ;;  %v552_v38 = vadd.f32 %v1538_v27, %v397_v20 }
  0x98   : > { %v799_v39 = vadd.f32 %v798_v34, %v666_v11  ;;  %v553_v40 = vadd.f32 %v1540_v28, %v398_v23  ;;  %v554_v41 = vadd.f32 %v1542_v29, %v399_v25  ;;  %v555_v42 = vadd.f32 %v1544_v30, %v400_v35  ;;  %v288_v23 = vld [vmem:[%s1499_s5 + $0x238] sm:$0xff]  ;;  %v289_v25 = vld [vmem:[%s1499_s5 + $0x240] sm:$0xff] }
  0x99   : > { %795 = vadd.xlane.f32.xlu0 %v794_v31  ;;  %v556_v44 = vadd.f32 %v1547_v32, %v401_v22  ;;  %v557_v45 = vadd.f32 %v1549_v33, %v402_v36  ;;  %v670_v47 = vmul.f32 %v551_v37, %v273_v62  ;;  %v671_v46 = vmul.f32 %v552_v38, %v274_v5  ;;  %v291_v36 = vld [vmem:[%s1499_s5 + $0x250] sm:$0xff]  ;;  %v292_v37 = vld [vmem:[%s1499_s5 + $0x258] sm:$0xff] }
  0x9a   : > { %v800_v51 = vadd.f32 %v799_v39, %v667_v14  ;;  %v802_v52 = vsel %vm738_vm0, %v669_v24, 0.0  ;;  %v672_v53 = vmul.f32 %v553_v40, %v275_v8  ;;  %v673_v54 = vmul.f32 %v554_v41, %v276_v6  ;;  %v290_v24 = vld [vmem:[%s1499_s5 + $0x248] sm:$0xff]  ;;  %v293_v41 = vld [vmem:[%s1499_s5 + $0x260] sm:$0xff] }
  0x9b   : > { %v674_v57 = vmul.f32 %v555_v42, %v277_v12  ;;  %v675_v58 = vmul.f32 %v556_v44, %v278_v13  ;;  %v806_v59 = vadd.f32 %v671_v46, %v670_v47  ;;  %v403_v61 = vmul.f32 %v1524_v15, %v280_v43 }
  0x9c   : > { %v801_v63 = vadd.f32 %v800_v51, %v668_v16  ;;  %v404_v62 = vmul.f32 %v1524_v15, %v281_v48  ;;  %v405_v2 = vmul.f32 %v1524_v15, %v282_v50  ;;  %v406_v4 = vmul.f32 %v1524_v15, %v283_v49 }
  0x9d   : > { %v676_v3 = vmul.f32 %v557_v45, %v279_v18  ;;  %v807_v5 = vadd.f32 %v806_v59, %v672_v53  ;;  %v407_v8 = vmul.f32 %v1524_v15, %v284_v55  ;;  %v408_v6 = vmul.f32 %v1524_v15, %v285_v56  ;;  %v294_v59 = vld [vmem:[%s1499_s5 + $0x268] sm:$0xff] }
  0x9e   : > { %v803_v7 = vadd.f32 %v802_v52, %v801_v63  ;;  %v409_v9 = vmul.f32 %v1524_v15, %v286_v60  ;;  %v558_v10 = vadd.f32 %v1536_v26, %v403_v61  ;;  %v559_v11 = vadd.f32 %v1538_v27, %v404_v62 }
  0x9f   : > { %v808_v12 = vadd.f32 %v807_v5, %v673_v54  ;;  %v560_v13 = vadd.f32 %v1540_v28, %v405_v2  ;;  %v561_v14 = vadd.f32 %v1542_v29, %v406_v4  ;;  %v562_v16 = vadd.f32 %v1544_v30, %v407_v8  ;;  %v295_v2 = vld [vmem:[%s1499_s5 + $0x270] sm:$0xff]  ;;  %v296_v4 = vld [vmem:[%s1499_s5 + $0x278] sm:$0xff] }
  0xa0   : > { %804 = vadd.xlane.f32.xlu1 %v803_v7  ;;  %v563_v18 = vadd.f32 %v1547_v32, %v408_v6  ;;  %v564_v19 = vadd.f32 %v1549_v33, %v409_v9  ;;  %v677_v21 = vmul.f32 %v558_v10, %v280_v43  ;;  %v678_v20 = vmul.f32 %v559_v11, %v281_v48  ;;  %v298_v9 = vld [vmem:[%s1499_s5 + $0x288] sm:$0xff]  ;;  %v299_v10 = vld [vmem:[%s1499_s5 + $0x290] sm:$0xff] }
  0xa1   : > { %v809_v34 = vadd.f32 %v808_v12, %v674_v57  ;;  %v811_v35 = vsel %vm738_vm0, %v676_v3, 0.0  ;;  %v679_v22 = vmul.f32 %v560_v13, %v282_v50  ;;  %v680_v31 = vmul.f32 %v561_v14, %v283_v49  ;;  %v297_v3 = vld [vmem:[%s1499_s5 + $0x280] sm:$0xff]  ;;  %v300_v14 = vld [vmem:[%s1499_s5 + $0x298] sm:$0xff] }
  0xa2   : > { %v681_v38 = vmul.f32 %v562_v16, %v284_v55  ;;  %v682_v39 = vmul.f32 %v563_v18, %v285_v56  ;;  %v815_v40 = vadd.f32 %v678_v20, %v677_v21  ;;  %v410_v42 = vmul.f32 %v1524_v15, %v287_v17 }
  0xa3   : > { %v810_v44 = vadd.f32 %v809_v34, %v675_v58  ;;  %v411_v43 = vmul.f32 %v1524_v15, %v288_v23  ;;  %v412_v45 = vmul.f32 %v1524_v15, %v289_v25  ;;  %v413_v47 = vmul.f32 %v1524_v15, %v290_v24 }
  0xa4   : > { %v683_v46 = vmul.f32 %v564_v19, %v286_v60  ;;  %v816_v48 = vadd.f32 %v815_v40, %v679_v22  ;;  %v414_v50 = vmul.f32 %v1524_v15, %v291_v36  ;;  %v415_v49 = vmul.f32 %v1524_v15, %v292_v37  ;;  %v301_v40 = vld [vmem:[%s1499_s5 + $0x2a0] sm:$0xff] }
  0xa5   : > { %v812_v51 = vadd.f32 %v811_v35, %v810_v44  ;;  %v416_v52 = vmul.f32 %v1524_v15, %v293_v41  ;;  %v565_v53 = vadd.f32 %v1536_v26, %v410_v42  ;;  %v566_v54 = vadd.f32 %v1538_v27, %v411_v43 }
  0xa6   : > { %v817_v55 = vadd.f32 %v816_v48, %v680_v31  ;;  %v567_v56 = vadd.f32 %v1540_v28, %v412_v45  ;;  %v568_v57 = vadd.f32 %v1542_v29, %v413_v47  ;;  %v569_v58 = vadd.f32 %v1544_v30, %v414_v50  ;;  %v302_v45 = vld [vmem:[%s1499_s5 + $0x2a8] sm:$0xff]  ;;  %v303_v47 = vld [vmem:[%s1499_s5 + $0x2b0] sm:$0xff] }
  0xa7   : > { %813 = vadd.xlane.f32.xlu0 %v812_v51  ;;  %v570_v60 = vadd.f32 %v1547_v32, %v415_v49  ;;  %v571_v61 = vadd.f32 %v1549_v33, %v416_v52  ;;  %v684_v63 = vmul.f32 %v565_v53, %v287_v17  ;;  %v685_v62 = vmul.f32 %v566_v54, %v288_v23  ;;  %v305_v52 = vld [vmem:[%s1499_s5 + $0x2c0] sm:$0xff]  ;;  %v306_v53 = vld [vmem:[%s1499_s5 + $0x2c8] sm:$0xff] }
  0xa8   : > { %v818_v5 = vadd.f32 %v817_v55, %v681_v38  ;;  %v820_v8 = vsel %vm738_vm0, %v683_v46, 0.0  ;;  %v686_v6 = vmul.f32 %v567_v56, %v289_v25  ;;  %v687_v7 = vmul.f32 %v568_v57, %v290_v24  ;;  %v304_v46 = vld [vmem:[%s1499_s5 + $0x2b8] sm:$0xff]  ;;  %v307_v57 = vld [vmem:[%s1499_s5 + $0x2d0] sm:$0xff] }
  0xa9   : > { %v688_v11 = vmul.f32 %v569_v58, %v291_v36  ;;  %v689_v12 = vmul.f32 %v570_v60, %v292_v37  ;;  %v824_v13 = vadd.f32 %v685_v62, %v684_v63  ;;  %v417_v16 = vmul.f32 %v1524_v15, %v294_v59 }
  0xaa   : > { %v819_v18 = vadd.f32 %v818_v5, %v682_v39  ;;  %v418_v17 = vmul.f32 %v1524_v15, %v295_v2  ;;  %v419_v19 = vmul.f32 %v1524_v15, %v296_v4  ;;  %v420_v21 = vmul.f32 %v1524_v15, %v297_v3 }
  0xab   : > { %v690_v20 = vmul.f32 %v571_v61, %v293_v41  ;;  %v825_v23 = vadd.f32 %v824_v13, %v686_v6  ;;  %v421_v25 = vmul.f32 %v1524_v15, %v298_v9  ;;  %v422_v24 = vmul.f32 %v1524_v15, %v299_v10  ;;  %v308_v13 = vld [vmem:[%s1499_s5 + $0x2d8] sm:$0xff] }
  0xac   : > { %v821_v34 = vadd.f32 %v820_v8, %v819_v18  ;;  %v423_v35 = vmul.f32 %v1524_v15, %v300_v14  ;;  %v572_v22 = vadd.f32 %v1536_v26, %v417_v16  ;;  %v573_v31 = vadd.f32 %v1538_v27, %v418_v17 }
  0xad   : > { %v826_v36 = vadd.f32 %v825_v23, %v687_v7  ;;  %v574_v37 = vadd.f32 %v1540_v28, %v419_v19  ;;  %v575_v38 = vadd.f32 %v1542_v29, %v420_v21  ;;  %v576_v39 = vadd.f32 %v1544_v30, %v421_v25  ;;  %v309_v19 = vld [vmem:[%s1499_s5 + $0x2e0] sm:$0xff]  ;;  %v310_v21 = vld [vmem:[%s1499_s5 + $0x2e8] sm:$0xff] }
  0xae   : > { %822 = vadd.xlane.f32.xlu1 %v821_v34  ;;  %v577_v41 = vadd.f32 %v1547_v32, %v422_v24  ;;  %v578_v42 = vadd.f32 %v1549_v33, %v423_v35  ;;  %v691_v44 = vmul.f32 %v572_v22, %v294_v59  ;;  %v692_v43 = vmul.f32 %v573_v31, %v295_v2  ;;  %v312_v35 = vld [vmem:[%s1499_s5 + $0x2f8] sm:$0xff]  ;;  %v313_v22 = vld [vmem:[%s1499_s5 + $0x300] sm:$0xff] }
  0xaf   : > { %v827_v48 = vadd.f32 %v826_v36, %v688_v11  ;;  %v829_v50 = vsel %vm738_vm0, %v690_v20, 0.0  ;;  %v693_v49 = vmul.f32 %v574_v37, %v296_v4  ;;  %v694_v51 = vmul.f32 %v575_v38, %v297_v3  ;;  %v311_v20 = vld [vmem:[%s1499_s5 + $0x2f0] sm:$0xff]  ;;  %v314_v38 = vld [vmem:[%s1499_s5 + $0x308] sm:$0xff] }
  0xb0   : > { %v695_v54 = vmul.f32 %v576_v39, %v298_v9  ;;  %v696_v55 = vmul.f32 %v577_v41, %v299_v10  ;;  %v833_v56 = vadd.f32 %v692_v43, %v691_v44  ;;  %v424_v58 = vmul.f32 %v1524_v15, %v301_v40 }
  0xb1   : > { %v828_v60 = vadd.f32 %v827_v48, %v689_v12  ;;  %v425_v59 = vmul.f32 %v1524_v15, %v302_v45  ;;  %v426_v61 = vmul.f32 %v1524_v15, %v303_v47  ;;  %v427_v63 = vmul.f32 %v1524_v15, %v304_v46 }
  0xb2   : > { %v697_v62 = vmul.f32 %v578_v42, %v300_v14  ;;  %v834_v2 = vadd.f32 %v833_v56, %v693_v49  ;;  %v428_v4 = vmul.f32 %v1524_v15, %v305_v52  ;;  %v429_v3 = vmul.f32 %v1524_v15, %v306_v53  ;;  %v315_v56 = vld [vmem:[%s1499_s5 + $0x310] sm:$0xff] }
  0xb3   : > { %v830_v5 = vadd.f32 %v829_v50, %v828_v60  ;;  %v430_v8 = vmul.f32 %v1524_v15, %v307_v57  ;;  %v579_v6 = vadd.f32 %v1536_v26, %v424_v58  ;;  %v580_v7 = vadd.f32 %v1538_v27, %v425_v59 }
  0xb4   : > { %v835_v9 = vadd.f32 %v834_v2, %v694_v51  ;;  %v581_v10 = vadd.f32 %v1540_v28, %v426_v61  ;;  %v582_v11 = vadd.f32 %v1542_v29, %v427_v63  ;;  %v583_v12 = vadd.f32 %v1544_v30, %v428_v4  ;;  %v316_v61 = vld [vmem:[%s1499_s5 + $0x318] sm:$0xff]  ;;  %v317_v63 = vld [vmem:[%s1499_s5 + $0x320] sm:$0xff] }
  0xb5   : > { %831 = vadd.xlane.f32.xlu0 %v830_v5  ;;  %v584_v14 = vadd.f32 %v1547_v32, %v429_v3  ;;  %v585_v16 = vadd.f32 %v1549_v33, %v430_v8  ;;  %v698_v18 = vmul.f32 %v579_v6, %v301_v40  ;;  %v699_v17 = vmul.f32 %v580_v7, %v302_v45  ;;  %v319_v8 = vld [vmem:[%s1499_s5 + $0x330] sm:$0xff]  ;;  %v320_v6 = vld [vmem:[%s1499_s5 + $0x338] sm:$0xff] }
  0xb6   : > { %v836_v23 = vadd.f32 %v835_v9, %v695_v54  ;;  %v838_v25 = vsel %vm738_vm0, %v697_v62, 0.0  ;;  %v700_v24 = vmul.f32 %v581_v10, %v303_v47  ;;  %v701_v34 = vmul.f32 %v582_v11, %v304_v46  ;;  %v318_v62 = vld [vmem:[%s1499_s5 + $0x328] sm:$0xff]  ;;  %v321_v11 = vld [vmem:[%s1499_s5 + $0x340] sm:$0xff] }
  0xb7   : > { %v702_v31 = vmul.f32 %v583_v12, %v305_v52  ;;  %v703_v36 = vmul.f32 %v584_v14, %v306_v53  ;;  %v842_v37 = vadd.f32 %v699_v17, %v698_v18  ;;  %v431_v39 = vmul.f32 %v1524_v15, %v308_v13 }
  0xb8   : > { %v837_v41 = vadd.f32 %v836_v23, %v696_v55  ;;  %v432_v40 = vmul.f32 %v1524_v15, %v309_v19  ;;  %v433_v42 = vmul.f32 %v1524_v15, %v310_v21  ;;  %v434_v44 = vmul.f32 %v1524_v15, %v311_v20 }
  0xb9   : > { %v704_v43 = vmul.f32 %v585_v16, %v307_v57  ;;  %v843_v45 = vadd.f32 %v842_v37, %v700_v24  ;;  %v435_v47 = vmul.f32 %v1524_v15, %v312_v35  ;;  %v436_v46 = vmul.f32 %v1524_v15, %v313_v22  ;;  %v322_v37 = vld [vmem:[%s1499_s5 + $0x348] sm:$0xff] }
  0xba   : > { %v839_v48 = vadd.f32 %v838_v25, %v837_v41  ;;  %v437_v50 = vmul.f32 %v1524_v15, %v314_v38  ;;  %v586_v49 = vadd.f32 %v1536_v26, %v431_v39  ;;  %v587_v51 = vadd.f32 %v1538_v27, %v432_v40 }
  0xbb   : > { %v844_v52 = vadd.f32 %v843_v45, %v701_v34  ;;  %v588_v53 = vadd.f32 %v1540_v28, %v433_v42  ;;  %v589_v54 = vadd.f32 %v1542_v29, %v434_v44  ;;  %v590_v55 = vadd.f32 %v1544_v30, %v435_v47  ;;  %v323_v42 = vld [vmem:[%s1499_s5 + $0x350] sm:$0xff]  ;;  %v324_v44 = vld [vmem:[%s1499_s5 + $0x358] sm:$0xff] }
  0xbc   : > { %840 = vadd.xlane.f32.xlu1 %v839_v48  ;;  %v591_v57 = vadd.f32 %v1547_v32, %v436_v46  ;;  %v592_v58 = vadd.f32 %v1549_v33, %v437_v50  ;;  %v705_v60 = vmul.f32 %v586_v49, %v308_v13  ;;  %v706_v59 = vmul.f32 %v587_v51, %v309_v19  ;;  %v326_v50 = vld [vmem:[%s1499_s5 + $0x368] sm:$0xff]  ;;  %v327_v49 = vld [vmem:[%s1499_s5 + $0x370] sm:$0xff] }
  0xbd   : > { %v845_v2 = vadd.f32 %v844_v52, %v702_v31  ;;  %v847_v4 = vsel %vm738_vm0, %v704_v43, 0.0  ;;  %v707_v3 = vmul.f32 %v588_v53, %v310_v21  ;;  %v708_v5 = vmul.f32 %v589_v54, %v311_v20  ;;  %v325_v43 = vld [vmem:[%s1499_s5 + $0x360] sm:$0xff]  ;;  %v328_v54 = vld [vmem:[%s1499_s5 + $0x378] sm:$0xff] }
  0xbe   : > { %v709_v7 = vmul.f32 %v590_v55, %v312_v35  ;;  %v710_v9 = vmul.f32 %v591_v57, %v313_v22  ;;  %v851_v10 = vadd.f32 %v706_v59, %v705_v60  ;;  %v438_v12 = vmul.f32 %v1524_v15, %v315_v56 }
  0xbf   : > { %v846_v14 = vadd.f32 %v845_v2, %v703_v36  ;;  %v439_v13 = vmul.f32 %v1524_v15, %v316_v61  ;;  %v440_v16 = vmul.f32 %v1524_v15, %v317_v63  ;;  %v441_v18 = vmul.f32 %v1524_v15, %v318_v62 }
  0xc0   : > { %v711_v17 = vmul.f32 %v592_v58, %v314_v38  ;;  %v852_v19 = vadd.f32 %v851_v10, %v707_v3  ;;  %v442_v21 = vmul.f32 %v1524_v15, %v319_v8  ;;  %v443_v20 = vmul.f32 %v1524_v15, %v320_v6  ;;  %v329_v10 = vld [vmem:[%s1499_s5 + $0x380] sm:$0xff] }
  0xc1   : > { %v848_v23 = vadd.f32 %v847_v4, %v846_v14  ;;  %v444_v25 = vmul.f32 %v1524_v15, %v321_v11  ;;  %v593_v24 = vadd.f32 %v1536_v26, %v438_v12  ;;  %v594_v34 = vadd.f32 %v1538_v27, %v439_v13  ;;  %v330_v13 = vld [vmem:[%s1499_s5 + $0x388] sm:$0xff] }
  0xc2   : > { %v853_v35 = vadd.f32 %v852_v19, %v708_v5  ;;  %v595_v22 = vadd.f32 %v1540_v28, %v440_v16  ;;  %v596_v31 = vadd.f32 %v1542_v29, %v441_v18  ;;  %v597_v36 = vadd.f32 %v1544_v30, %v442_v21  ;;  %v331_v16 = vld [vmem:[%s1499_s5 + $0x390] sm:$0xff]  ;;  %v332_v18 = vld [vmem:[%s1499_s5 + $0x398] sm:$0xff] }
  0xc3   : > { %849 = vadd.xlane.f32.xlu0 %v848_v23  ;;  %v598_v38 = vadd.f32 %v1547_v32, %v443_v20  ;;  %v599_v39 = vadd.f32 %v1549_v33, %v444_v25  ;;  %v712_v41 = vmul.f32 %v593_v24, %v315_v56  ;;  %v713_v40 = vmul.f32 %v594_v34, %v316_v61  ;;  %v333_v23 = vld [vmem:[%s1499_s5 + $0x3a0] sm:$0xff]  ;;  %v334_v25 = vld [vmem:[%s1499_s5 + $0x3a8] sm:$0xff] }
  0xc4   : > { %v854_v45 = vadd.f32 %v853_v35, %v709_v7  ;;  %v856_v47 = vsel %vm738_vm0, %v711_v17, 0.0  ;;  %v714_v46 = vmul.f32 %v595_v22, %v317_v63  ;;  %v715_v48 = vmul.f32 %v596_v31, %v318_v62  ;;  %v335_v22 = vld [vmem:[%s1499_s5 + $0x3b0] sm:$0xff] }
  0xc5   : > { %v716_v51 = vmul.f32 %v597_v36, %v319_v8  ;;  %v717_v52 = vmul.f32 %v598_v38, %v320_v6  ;;  %v860_v53 = vadd.f32 %v713_v40, %v712_v41  ;;  %v445_v55 = vmul.f32 %v1524_v15, %v322_v37 }
  0xc6   : > { %v855_v57 = vadd.f32 %v854_v45, %v710_v9  ;;  %v446_v56 = vmul.f32 %v1524_v15, %v323_v42  ;;  %v447_v58 = vmul.f32 %v1524_v15, %v324_v44  ;;  %v448_v60 = vmul.f32 %v1524_v15, %v325_v43 }
  0xc7   : > { %v718_v59 = vmul.f32 %v599_v39, %v321_v11  ;;  %v861_v61 = vadd.f32 %v860_v53, %v714_v46  ;;  %v449_v63 = vmul.f32 %v1524_v15, %v326_v50  ;;  %v450_v62 = vmul.f32 %v1524_v15, %v327_v49 }
  0xc8   : > { %v857_v2 = vadd.f32 %v856_v47, %v855_v57  ;;  %v451_v4 = vmul.f32 %v1524_v15, %v328_v54  ;;  %v600_v3 = vadd.f32 %v1536_v26, %v445_v55  ;;  %v601_v5 = vadd.f32 %v1538_v27, %v446_v56 }
  0xc9   : > { %v862_v8 = vadd.f32 %v861_v61, %v715_v48  ;;  %v602_v6 = vadd.f32 %v1540_v28, %v447_v58  ;;  %v603_v7 = vadd.f32 %v1542_v29, %v448_v60  ;;  %v604_v9 = vadd.f32 %v1544_v30, %v449_v63 }
  0xca   : > { %858 = vadd.xlane.f32.xlu1 %v857_v2  ;;  %v606_v11 = vadd.f32 %v1549_v33, %v451_v4  ;;  %v719_v12 = vmul.f32 %v600_v3, %v322_v37  ;;  %v720_v14 = vmul.f32 %v601_v5, %v323_v42  ;;  %v865_v19 = vsel %vm738_vm0, %v718_v59, 0.0 }
  0xcb   : > { %v863_v17 = vadd.f32 %v862_v8, %v716_v51  ;;  %v605_v21 = vadd.f32 %v1547_v32, %v450_v62  ;;  %v721_v20 = vmul.f32 %v602_v6, %v324_v44  ;;  %v722_v24 = vmul.f32 %v603_v7, %v325_v43 }
  0xcc   : > { %v723_v34 = vmul.f32 %v604_v9, %v326_v50  ;;  %v869_v35 = vadd.f32 %v720_v14, %v719_v12  ;;  %v452_v31 = vmul.f32 %v1524_v15, %v329_v10  ;;  %v453_v37 = vmul.f32 %v1524_v15, %v330_v13 }
  0xcd   : > { %v864_v36 = vadd.f32 %v863_v17, %v717_v52  ;;  %v454_v38 = vmul.f32 %v1524_v15, %v331_v16  ;;  %v455_v39 = vmul.f32 %v1524_v15, %v332_v18  ;;  %v725_v41 = vmul.f32 %v606_v11, %v328_v54 }
  0xce   : > { %v870_v40 = vadd.f32 %v869_v35, %v721_v20  ;;  %v456_v42 = vmul.f32 %v1524_v15, %v333_v23  ;;  %v457_v44 = vmul.f32 %v1524_v15, %v334_v25  ;;  %v458_v43 = vmul.f32 %v1524_v15, %v335_v22 }
  0xcf   : > { %v866_v45 = vadd.f32 %v865_v19, %v864_v36  ;;  %v607_v47 = vadd.f32 %v1536_v26, %v452_v31  ;;  %v608_v46 = vadd.f32 %v1538_v27, %v453_v37  ;;  %v724_v48 = vmul.f32 %v605_v21, %v327_v49 }
  0xd0   : > { %v871_v50 = vadd.f32 %v870_v40, %v722_v24  ;;  %v609_v51 = vadd.f32 %v1540_v28, %v454_v38  ;;  %v610_v52 = vadd.f32 %v1542_v29, %v455_v39  ;;  %v611_v53 = vadd.f32 %v1544_v30, %v456_v42 }
  0xd1   : > { %867 = vadd.xlane.f32.xlu0 %v866_v45  ;;  %v726_v54 = vmul.f32 %v607_v47, %v329_v10  ;;  %v727_v55 = vmul.f32 %v608_v46, %v330_v13  ;;  %v613_v56 = vadd.f32 %v1549_v33, %v458_v43  ;;  %v874_v15 = vsel %vm738_vm0, %v725_v41, 0.0 }
  0xd2   : > { %v872_v57 = vadd.f32 %v871_v50, %v723_v34  ;;  %v728_v58 = vmul.f32 %v609_v51, %v331_v16  ;;  %v612_v26 = vadd.f32 %v1547_v32, %v457_v44  ;;  %v729_v27 = vmul.f32 %v610_v52, %v332_v18 }
  0xd3   : > { %v878_v49 = vadd.f32 %v727_v55, %v726_v54  ;;  %v730_v59 = vmul.f32 %v611_v53, %v333_v23  ;;  %v732_v29 = vmul.f32 %v613_v56, %v335_v22  ;;  %v1910_v32 = vand.u32 127, %v460_v0 }
  0xd4   : > { %v873_v60 = vadd.f32 %v872_v57, %v724_v48  ;;  %v731_v63 = vmul.f32 %v612_v26, %v334_v25  ;;  %vm1006_vm13 = vcmask 917312   ;;  %vm1013_vm14 = vcmask 982912  }
  0xd5   : > { %v879_v28 = vadd.f32 %v878_v49, %v728_v58  ;;  %v883_v2 = vsel %vm738_vm0, %v732_v29, 0.0  ;;  %v917_v6 = vadd.s32 4294967288, %v1910_v32  ;;  %v924_v11 = vadd.s32 4294967280, %v1910_v32 }
  0xd6   : > { %v875_v61 = vadd.f32 %v874_v15, %v873_v60  ;;  %v1917_v12 = vsub.s32 %v1910_v32, %v1510_v1  ;;  %v931_v14 = vadd.s32 4294967272, %v1910_v32  ;;  %v938_v17 = vadd.s32 4294967264, %v1910_v32 }
  0xd7   : > { %v880_v62 = vadd.f32 %v879_v28, %v729_v27  ;;  %v920_v9 = vsub.s32 %v917_v6, %v1510_v1  ;;  %v927_v18 = vsub.s32 %v924_v11, %v1510_v1  ;;  %v945_v25 = vadd.s32 4294967256, %v1910_v32 }
  0xd8   : > { %876 = vadd.xlane.f32.xlu1 %v875_v61  ;;  %v934_v21 = vsub.s32 %v931_v14, %v1510_v1  ;;  %v941_v34 = vsub.s32 %v938_v17, %v1510_v1  ;;  %v952_v35 = vadd.s32 4294967248, %v1910_v32  ;;  %v959_v38 = vadd.s32 4294967240, %v1910_v32 }
  0xd9   : > { %v881_v30 = vadd.f32 %v880_v62, %v730_v59  ;;  %v948_v37 = vsub.s32 %v945_v25, %v1510_v1  ;;  %v966_v42 = vadd.s32 4294967232, %v1910_v32  ;;  %v973_v46 = vadd.s32 4294967224, %v1910_v32 }
  0xda   : > { %v955_v40 = vsub.s32 %v952_v35, %v1510_v1  ;;  %v962_v47 = vsub.s32 %v959_v38, %v1510_v1  ;;  %v980_v52 = vadd.s32 4294967216, %v1910_v32  ;;  %v987_v56 = vadd.s32 4294967208, %v1910_v32 }
  0xdb   : > { %v882_v4 = vadd.f32 %v881_v30, %v731_v63  ;;  %v969_v51 = vsub.s32 %v966_v42, %v1510_v1  ;;  %v976_v57 = vsub.s32 %v973_v46, %v1510_v1  ;;  %v994_v49 = vadd.s32 4294967200, %v1910_v32 }
  0xdc   : > { %v983_v26 = vsub.s32 %v980_v52, %v1510_v1  ;;  %v990_v28 = vsub.s32 %v987_v56, %v1510_v1  ;;  %v1001_v29 = vadd.s32 4294967192, %v1910_v32  ;;  %vm1020_vm15 = vcmask 1048512  }
  0xdd   : > { %v884_v33 = vadd.f32 %v883_v2, %v882_v4  ;;  %v997_v30 = vsub.s32 %v994_v49, %v1510_v1  ;;  %v1008_v2 = vadd.s32 4294967184, %v1910_v32 }
  0xdf   : > { %885 = vadd.xlane.f32.xlu0 %v884_v33 }
  0xfa   : > { %v742_v3 = vpop.xlane.xlu0 %741 }
  0xfb   : > { %v916_v19 = vrot.slane %v742_v3, %v1917_v12 }
  0xff   : > { %v760_v5 = vpop.xlane.xlu1 %759 }
 0x100   : > { %v928_v24 = vrot.slane %v760_v5, %v927_v18  ;;  %v1004_v5 = vsub.s32 %v1001_v29, %v1510_v1 }
 0x106   : > { %v751_v8 = vpop.xlane.xlu0 %750 }
 0x107   : > { %v921_v16 = vrot.slane %v751_v8, %v920_v9  ;;  %v1015_v8 = vadd.s32 4294967176, %v1910_v32  ;;  %v1011_v9 = vsub.s32 %v1008_v2, %v1510_v1 }
 0x109   : > { %v923_v23 = vsel %vm922_vm1, %v921_v16, %v916_v19  ;;  %v890_v16 = vadd.s32 128, %v1910_v32 }
 0x10a   : > { %v930_v36 = vsel %vm929_vm2, %v928_v24, %v923_v23  ;;  %vm1050_vm2 = vcmp.lt.s32.totalorder %v460_v0, 136 }
 0x10d   : > { %v769_v7 = vpop.xlane.xlu1 %768 }
 0x10e   : > { %v935_v31 = vrot.slane %v769_v7, %v934_v21  ;;  %v891_v21 = vstv %s887_s11 }
 0x10f   : > { %v893_v35 = vadd.s32 %v891_v21, %v890_v16 }
 0x110   : > { %v937_v44 = vsel %vm936_vm3, %v935_v31, %v930_v36 }
 0x111   : > { %vm895_vm1 = vcmp.lt.s32.totalorder %v893_v35, 260 }
 0x114   : > { %v778_v10 = vpop.xlane.xlu0 %777 }
 0x115   : > { %v942_v41 = vrot.slane %v778_v10, %v941_v34  ;;  %v892_v34 = vadd.s32 %v891_v21, %v1910_v32 }
 0x117   : > { %v944_v48 = vsel %vm943_vm4, %v942_v41, %v937_v44  ;;  %vm894_vm0 = vcmp.lt.s32.totalorder %v892_v34, 260 }
 0x11b   : > { %v787_v13 = vpop.xlane.xlu1 %786 }
 0x11c   : > { %v949_v43 = vrot.slane %v787_v13, %v948_v37  ;;  %v1018_v13 = vsub.s32 %v1015_v8, %v1510_v1 }
 0x11e   : > { %v951_v54 = vsel %vm950_vm5, %v949_v43, %v944_v48 }
 0x122   : > { %v796_v20 = vpop.xlane.xlu0 %795 }
 0x123   : > { %v956_v50 = vrot.slane %v796_v20, %v955_v40  ;;  %v1350_v20 = vmov 1966171168  }
 0x124   : > { %v1034_v23 = vunpack.c.l.s4 %v1350_v20 }
 0x125   : > { %v958_v58 = vsel %vm957_vm6, %v956_v50, %v951_v54 }
 0x126   : > { %v1035_v31 = vunpack.c.0.s8 %v1034_v23 }
 0x129   : > { %v805_v22 = vpop.xlane.xlu1 %804 }
 0x12a   : > { %v963_v55 = vrot.slane %v805_v22, %v962_v47 }
 0x12c   : > { %v965_v60 = vsel %vm964_vm7, %v963_v55, %v958_v58 }
 0x130   : > { %v814_v39 = vpop.xlane.xlu0 %813 }
 0x131   : > { %v970_v15 = vrot.slane %v814_v39, %v969_v51  ;;  %v1038_v39 = vsub.s32 %v1035_v31, %v1510_v1 }
 0x133   : > { %v972_v63 = vsel %vm971_vm8, %v970_v15, %v965_v60 }
 0x137   : > { %v823_v45 = vpop.xlane.xlu1 %822 }
 0x138   : > { %v977_v59 = vrot.slane %v823_v45, %v976_v57 }
 0x13a   : > { %v979_v33 = vsel %vm978_vm9, %v977_v59, %v972_v63 }
 0x13e   : > { %v832_v53 = vpop.xlane.xlu0 %831 }
 0x13f   : > { %v984_v62 = vrot.slane %v832_v53, %v983_v26 }
 0x141   : > { %v986_v6 = vsel %vm985_vm10, %v984_v62, %v979_v33 }
 0x145   : > { %v841_v27 = vpop.xlane.xlu1 %840 }
 0x146   : > { %v991_v3 = vrot.slane %v841_v27, %v990_v28 }
 0x148   : > { %v993_v11 = vsel %vm992_vm11, %v991_v3, %v986_v6 }
 0x14c   : > { %v850_v61 = vpop.xlane.xlu0 %849 }
 0x14d   : > { %v998_v7 = vrot.slane %v850_v61, %v997_v30 }
 0x14f   : > { %v1000_v18 = vsel %vm999_vm12, %v998_v7, %v993_v11 }
 0x153   : > { %v859_v4 = vpop.xlane.xlu1 %858 }
 0x154   : > { %v1005_v14 = vrot.slane %v859_v4, %v1004_v5 }
 0x156   : > { %v1007_v25 = vsel %vm1006_vm13, %v1005_v14, %v1000_v18 }
 0x15a   : > { %v868_v10 = vpop.xlane.xlu0 %867 }
 0x15b   : > { %v1012_v17 = vrot.slane %v868_v10, %v1011_v9 }
 0x15d   : > { %v1014_v22 = vsel %vm1013_vm14, %v1012_v17, %v1007_v25 }
 0x161   : > { %v877_v19 = vpop.xlane.xlu1 %876 }
 0x162   : > { %v1019_v24 = vrot.slane %v877_v19, %v1018_v13 }
 0x164   : > { %v1021_v36 = vsel %vm1020_vm15, %v1019_v24, %v1014_v22 }
 0x165   : > { %v1028_v41 = vsel %vm894_vm0, %v1021_v36, 0.0 }
 0x168   : > { %v886_v37 = vpop.xlane.xlu0 %885 }
 0x169   : > { %v1025_v38 = vrot.slane %v886_v37, %v1917_v12 }
 0x16b   : > { %v1029_v40 = vsel %vm895_vm1, %v1025_v38, 0.0 }
 0x16c   : > { %v1032_v42 = vcombine.low %v1028_v41, %v1029_v40 }
 0x16e   : > { %v1039_v32 = vrot.slane %v1032_v42, %v1038_v39 }
 0x170   : > { %v1046_v44 = vrot.slane %v1039_v32, %v1038_v39 }
 0x172   : > { %1052 = vst.msk [vmem:[%s210_s29] sm:$0x3] %vm1050_vm2, %v1046_v44 }
 0x173   : > { %1289 = shalt.err (!%p1286_p9)
}
 0x174   : > { %s1290_s23 = scalar_lea.hbm %s1066_s9, 32  ;;  %s1294_s4 = scalar_lea.hbm %s1992_s3, 64 }
 0x175   : > { %p1291_p10 = scmp.ne.s32.totalorder %s1066_s9, %s1290_s23  ;;  %p1295_p1 = scmp.lt.s32.totalorder %s1066_s9, %s1992_s3 }
 0x176   : > { %p1296_p0 = scmp.lt.s32.totalorder %s1294_s4, %s1290_s23 }
 0x177   : > { %p1292_p11 = pnand %p1291_p10, %p2002_p13 }
 0x178   : > { %p1297_p6 = por %p1296_p0, %p1295_p1 }
 0x179   : > { %p1293_p12 = pneg %p1292_p11 }
 0x17b   : > { %p1298_p4 = pnand %p1297_p6, %p1293_p12 }
 0x17d   : > { %1301 = shalt.err (!%p1298_p4)
}
 0x17e   : > { %1174 = dma.vmem_to_hbm [thread:$0]  (%p2002_p13), %s1069_s6, 32, %s1066_s9, %s1054_s10  }
 0x17f PF: > { %s1080_s24 = sand.u32 1, %s1332_s14   ;;  %p2003_p5 = scmp.ne.s32.totalorder %s1999_s26, 0 }
 0x180   : > { %p2004_p2 = scmp.ge.s32.totalorder %s1344_s17, 2  ;;  %s1081_s11 = scalar_lea.sflag [#allocation5], %s1080_s24 }
 0x182   : > { %p1181_p7 = pnand %p2004_p2, %p2003_p5 }
 0x184   : > { %p1182_p3 = pneg %p1181_p7 }
 0x186   : > { %1327 = dma.done.wait (%p1182_p3), %s1081_s11, 32  }
 0x187   : > { %1329 = vsyncadd (%p1182_p3), %s1081_s11, 4294967264  ;;  %p18_p8 = scmp.ge.s32.totalorder %s1400_s19, 4   ;;  %s2005_s14 = smov %s1336_s15 }
 0x188   : > { %s2006_s15 = smov %s1340_s16  ;;  %s2007_s16 = smov %s1412_s22 }
 0x189   : > { %s2008_s17 = smov %s1400_s19  ;;  %20 = sbr.rel (!%p18_p8) target bundleno = 8 (0x8), region = 81 }
 0x18e   :  { %1086 = vsyncpa [#allocation4], 1 }
 0x18f   :  { %1088 = vsyncpa [#allocation4 + $0x1], 1 }
 0x190   :  { %1089 = vsyncpa [#allocation7], 1 }
 0x191   :  { %1090 = vsyncpa [#allocation5], 1 }
 0x192   :  { %1092 = vsyncpa [#allocation5 + $0x1], 1 }

</bundles_post_ra>
